<compile_context>
chip_gen: v7x
topology: tpu7x:2x2x1
jax: 0.10.0
libtpu: 0.0.40
codegen_flags: <defaults>
</compile_context>

<pallas_src>
import functools

import jax
import jax.numpy as jnp
from jax.experimental import pallas as pl
from jax.experimental.pallas import tpu as pltpu


def _gelu_tanh(x):
    # 0.5 * x * (1 + tanh(sqrt(2/pi) * (x + 0.044715 * x^3)))  -- matches the
    # PyTorch GELU module (tanh approximation). Done in f32.
    c = jnp.sqrt(jnp.asarray(2.0 / jnp.pi, dtype=x.dtype))
    return 0.5 * x * (1.0 + jnp.tanh(c * (x + 0.044715 * (x * x * x))))


def _ffn_kernel(x_ref, w1_ref, b1_ref, w2_ref, b2_ref, o_ref):
    # x_ref : (tm, D)  f32   streamed token tile
    # w1_ref: (D, H)   bf16  resident fc1 weight (H = 4*D)
    # b1_ref: (1, H)   f32
    # w2_ref: (H, D)   bf16  resident fc2 weight
    # b2_ref: (1, D)   f32
    # o_ref : (tm, D)  f32
    x = x_ref[...].astype(jnp.bfloat16)                       # MXU-native dtype
    h = jnp.dot(x, w1_ref[...], preferred_element_type=jnp.float32)
    h = _gelu_tanh(h + b1_ref[...])                           # bias + GELU in f32
    y = jnp.dot(h.astype(jnp.bfloat16), w2_ref[...],
                preferred_element_type=jnp.float32)
    o_ref[...] = (y + b2_ref[...]).astype(o_ref.dtype)


def _round_up(x, m):
    return (x + m - 1) // m * m


@functools.partial(jax.jit, static_argnames=("tm",))
def feed_forward(x, w1, b1, w2, b2, *, tm=256):
    """x: (batch, seq, emb_dim) float32. Returns same shape/dtype."""
    B, S, D = x.shape
    H = w1.shape[1]
    M = B * S

    # Large token tile, but never larger than the (8-aligned) problem.
    tm_eff = min(tm, _round_up(M, 8))
    Mp = _round_up(M, tm_eff)

    x2 = x.reshape(M, D)
    if Mp != M:
        x2 = jnp.pad(x2, ((0, Mp - M), (0, 0)))

    # Pre-cast weights once: halves weight DMA/VMEM and avoids per-step casts.
    w1_b = w1.astype(jnp.bfloat16)
    w2_b = w2.astype(jnp.bfloat16)
    b1_2 = b1.reshape(1, H).astype(jnp.float32)
    b2_2 = b2.reshape(1, D).astype(jnp.float32)

    # VMEM budget: double-buffered bf16 weights + f32 biases + double-buffered
    # f32 x/out tiles + the f32 (tm, H) intermediate, with headroom.
    vmem_bytes = (
        2 * 2 * (D * H + H * D)      # weights (bf16) x 2 buffers
        + 2 * 4 * (H + D)            # biases (f32) x 2 buffers
        + 2 * 2 * 4 * tm_eff * D     # x + out tiles (f32) x 2 buffers
        + 4 * tm_eff * H             # intermediate h (f32)
    )
    vmem_limit = max(32 << 20, min(2 * vmem_bytes + (2 << 20), 64 << 20))

    out = pl.pallas_call(
        _ffn_kernel,
        out_shape=jax.ShapeDtypeStruct((Mp, D), x.dtype),
        grid_spec=pltpu.PrefetchScalarGridSpec(
            num_scalar_prefetch=0,
            grid=(Mp // tm_eff,),
            in_specs=[
                pl.BlockSpec((tm_eff, D), lambda i: (i, 0)),   # x tile (streamed)
                pl.BlockSpec((D, H), lambda i: (0, 0)),        # w1 (resident)
                pl.BlockSpec((1, H), lambda i: (0, 0)),        # b1
                pl.BlockSpec((H, D), lambda i: (0, 0)),        # w2 (resident)
                pl.BlockSpec((1, D), lambda i: (0, 0)),        # b2
            ],
            out_specs=pl.BlockSpec((tm_eff, D), lambda i: (i, 0)),
        ),
        compiler_params=pltpu.CompilerParams(
            dimension_semantics=("parallel",),
            vmem_limit_bytes=vmem_limit,
        ),
    )(x2, w1_b, b1_2, w2_b, b2_2)

    if Mp != M:
        out = out[:M]
    return out.reshape(B, S, D)


def feed_forward_ref(x, w1, b1, w2, b2):
    h = x @ w1 + b1
    h = _gelu_tanh(h)
    return h @ w2 + b2


def _init_params(key, D):
    H = 4 * D
    kw1, kb1, kw2, kb2 = jax.random.split(key, 4)
    # nn.Linear-style init: uniform +/- 1/sqrt(fan_in).
    lim1 = 1.0 / jnp.sqrt(jnp.float32(D))
    lim2 = 1.0 / jnp.sqrt(jnp.float32(H))
    w1 = jax.random.uniform(kw1, (D, H), jnp.float32, -lim1, lim1)
    b1 = jax.random.uniform(kb1, (H,), jnp.float32, -lim1, lim1)
    w2 = jax.random.uniform(kw2, (H, D), jnp.float32, -lim2, lim2)
    b2 = jax.random.uniform(kb2, (D,), jnp.float32, -lim2, lim2)
    return w1, b1, w2, b2


if __name__ == "__main__":
    # cfg = {'emb_dim': 32}; primary test shape batch=2, seq=8.
    D = 32
    key = jax.random.PRNGKey(0)
    kp, kx = jax.random.split(key)
    w1, b1, w2, b2 = _init_params(kp, D)

    # (2, 8): single-tile toy case; (3, 7): exercises token padding;
    # (4, 128): exercises a multi-step pipelined grid (M=512, tm=256).
    shapes = [(2, 8), (3, 7), (4, 128)]
    xkeys = jax.random.split(kx, len(shapes))
    for (B, S), k in zip(shapes, xkeys):
        x = jax.random.normal(k, (B, S, D), jnp.float32)
        y = jax.block_until_ready(feed_forward(x, w1, b1, w2, b2))
        y_ref = feed_forward_ref(x, w1, b1, w2, b2)
        assert y.shape == (B, S, D)
        # bf16 MXU inputs with f32 accumulation -> ~0.4% relative error budget.
        assert jnp.allclose(y, y_ref, atol=2e-2, rtol=2e-2), f"mismatch at {(B, S)}"

    print("KERNEL_OK")
</pallas_src>

<mosaic_0001>
module attributes {stable_mosaic.version = 11 : i64} {
  func.func @_ffn_kernel(%arg0: i32, %arg1: memref<16x32xf32, #tpu.memory_space<vmem>>, %arg2: memref<32x128xbf16, #tpu.memory_space<vmem>>, %arg3: memref<1x128xf32, #tpu.memory_space<vmem>>, %arg4: memref<128x32xbf16, #tpu.memory_space<vmem>>, %arg5: memref<1x32xf32, #tpu.memory_space<vmem>>, %arg6: memref<16x32xf32, #tpu.memory_space<vmem>>) attributes {dimension_semantics = [#tpu.dimension_semantics<parallel>], iteration_bounds = array<i64: 1>, scalar_prefetch = 0 : i64, scratch_operands = 0 : i64, tpu.core_type = #tpu.core_type<tc>, window_params = [{transform_indices = @transform_0, window_bounds = array<i64: 16, 32>}, {pipeline_mode = #tpu.pipeline_mode<synchronous>, transform_indices = @transform_1, window_bounds = array<i64: 32, 128>}, {pipeline_mode = #tpu.pipeline_mode<synchronous>, transform_indices = @transform_2, window_bounds = array<i64: 1, 128>}, {pipeline_mode = #tpu.pipeline_mode<synchronous>, transform_indices = @transform_3, window_bounds = array<i64: 128, 32>}, {pipeline_mode = #tpu.pipeline_mode<synchronous>, transform_indices = @transform_4, window_bounds = array<i64: 1, 32>}, {transform_indices = @transform_5, window_bounds = array<i64: 16, 32>}]} {
    %c0 = arith.constant 0 : index
    %c0_0 = arith.constant 0 : index
    %0 = vector.load %arg1[%c0, %c0_0] : memref<16x32xf32, #tpu.memory_space<vmem>>, vector<16x32xf32>
    %1 = arith.truncf %0 : vector<16x32xf32> to vector<16x32xbf16>
    %c0_1 = arith.constant 0 : index
    %c0_2 = arith.constant 0 : index
    %2 = vector.load %arg2[%c0_1, %c0_2] : memref<32x128xbf16, #tpu.memory_space<vmem>>, vector<32x128xbf16>
    %cst = arith.constant dense<0.000000e+00> : vector<16x128xf32>
    %3 = tpu.matmul %1, %2, %cst {dimension_numbers = #tpu.dot_dimension_numbers<[1], [0], [0], [1], [0, 0, 1, 1], [], []>} : vector<16x32xbf16>, vector<32x128xbf16>, vector<16x128xf32> -> vector<16x128xf32>
    %c0_3 = arith.constant 0 : index
    %c0_4 = arith.constant 0 : index
    %4 = vector.load %arg3[%c0_3, %c0_4] : memref<1x128xf32, #tpu.memory_space<vmem>>, vector<1x128xf32>
    %5 = vector.broadcast %4 : vector<1x128xf32> to vector<16x128xf32>
    %6 = arith.addf %3, %5 : vector<16x128xf32>
    %cst_5 = arith.constant 0.636619746 : f32
    %7 = math.sqrt %cst_5 : f32
    %cst_6 = arith.constant 5.000000e-01 : f32
    %8 = vector.broadcast %cst_6 : f32 to vector<16x128xf32>
    %9 = arith.mulf %8, %6 : vector<16x128xf32>
    %10 = arith.mulf %6, %6 : vector<16x128xf32>
    %11 = arith.mulf %10, %6 : vector<16x128xf32>
    %cst_7 = arith.constant 4.471500e-02 : f32
    %12 = vector.broadcast %cst_7 : f32 to vector<16x128xf32>
    %13 = arith.mulf %12, %11 : vector<16x128xf32>
    %14 = arith.addf %6, %13 : vector<16x128xf32>
    %15 = vector.broadcast %7 : f32 to vector<16x128xf32>
    %16 = arith.mulf %15, %14 : vector<16x128xf32>
    %17 = math.tanh %16 : vector<16x128xf32>
    %cst_8 = arith.constant 1.000000e+00 : f32
    %18 = vector.broadcast %cst_8 : f32 to vector<16x128xf32>
    %19 = arith.addf %18, %17 : vector<16x128xf32>
    %20 = arith.mulf %9, %19 : vector<16x128xf32>
    %21 = arith.truncf %20 : vector<16x128xf32> to vector<16x128xbf16>
    %c0_9 = arith.constant 0 : index
    %c0_10 = arith.constant 0 : index
    %22 = vector.load %arg4[%c0_9, %c0_10] : memref<128x32xbf16, #tpu.memory_space<vmem>>, vector<128x32xbf16>
    %cst_11 = arith.constant dense<0.000000e+00> : vector<16x32xf32>
    %23 = tpu.matmul %21, %22, %cst_11 {dimension_numbers = #tpu.dot_dimension_numbers<[1], [0], [0], [1], [0, 0, 1, 1], [], []>} : vector<16x128xbf16>, vector<128x32xbf16>, vector<16x32xf32> -> vector<16x32xf32>
    %c0_12 = arith.constant 0 : index
    %c0_13 = arith.constant 0 : index
    %24 = vector.load %arg5[%c0_12, %c0_13] : memref<1x32xf32, #tpu.memory_space<vmem>>, vector<1x32xf32>
    %25 = vector.broadcast %24 : vector<1x32xf32> to vector<16x32xf32>
    %26 = arith.addf %23, %25 : vector<16x32xf32>
    %c0_14 = arith.constant 0 : index
    %c0_15 = arith.constant 0 : index
    %27 = vector.load %arg6[%c0_14, %c0_15] : memref<16x32xf32, #tpu.memory_space<vmem>>, vector<16x32xf32>
    tpu.vector_store %arg6[%c0_14, %c0_15], %26 {strides = array<i32>} : memref<16x32xf32, #tpu.memory_space<vmem>>, vector<16x32xf32>,
    return
  }
  func.func @transform_0(%arg0: i32) -> (i32, i32) {
    %c0_i32 = arith.constant 0 : i32
    %c0_i32_0 = arith.constant 0 : i32
    return %arg0, %c0_i32 : i32, i32
  }
  func.func @transform_1(%arg0: i32) -> (i32, i32) {
    %c0_i32 = arith.constant 0 : i32
    %c0_i32_0 = arith.constant 0 : i32
    %c0_i32_1 = arith.constant 0 : i32
    return %c0_i32, %c0_i32_0 : i32, i32
  }
  func.func @transform_2(%arg0: i32) -> (i32, i32) {
    %c0_i32 = arith.constant 0 : i32
    %c0_i32_0 = arith.constant 0 : i32
    %c0_i32_1 = arith.constant 0 : i32
    return %c0_i32, %c0_i32_0 : i32, i32
  }
  func.func @transform_3(%arg0: i32) -> (i32, i32) {
    %c0_i32 = arith.constant 0 : i32
    %c0_i32_0 = arith.constant 0 : i32
    %c0_i32_1 = arith.constant 0 : i32
    return %c0_i32, %c0_i32_0 : i32, i32
  }
  func.func @transform_4(%arg0: i32) -> (i32, i32) {
    %c0_i32 = arith.constant 0 : i32
    %c0_i32_0 = arith.constant 0 : i32
    %c0_i32_1 = arith.constant 0 : i32
    return %c0_i32, %c0_i32_0 : i32, i32
  }
  func.func @transform_5(%arg0: i32) -> (i32, i32) {
    %c0_i32 = arith.constant 0 : i32
    %c0_i32_0 = arith.constant 0 : i32
    return %arg0, %c0_i32 : i32, i32
  }
}

</mosaic_0001>

<bundles_post_ra>
// kernel: feed_forward.1
= control target key start
LH: loop header
LB: loop body
LE: loop exit
PB: predicated region body
PF: predicated region fallthrough
CT: control target
= control target key end

     0   :  { %v338_v1 = vmov 0.0   ;;  %vm339_vm0 = vmmov 0   ;;  %vm48_vm1 = vcmask 261120   ;;  %s430_s0 = inlined_call_operand.vmem [shape: f32[16,32], index: 0, kind: input, shape index: {}]   ;;  %s431_s1 = inlined_call_operand.vmem [shape: bf16[32,128], index: 1, kind: input, shape index: {}]   ;;  %s432_s2 = inlined_call_operand.vmem [shape: f32[1,128], index: 2, kind: input, shape index: {}]   ;;  %s433_s3 = inlined_call_operand.vmem [shape: bf16[128,32], index: 3, kind: input, shape index: {}]   ;;  %s434_s4 = inlined_call_operand.vmem [shape: f32[1,32], index: 4, kind: input, shape index: {}]   ;;  %s435_s5 = inlined_call_operand.hbm [shape: f32[16,32], index: 5, kind: output, shape index: {}]  }
   0x1   :  { %v300_v0 = vld [vmem:[%s431_s1] sm:$0xff]   ;;  %267 = vmatprep.subr.bf16.mxu0 %v338_v1  ;;  %275 = vmatprep.subr.bf16.mxu1 %v338_v1  ;;  %v301_v2 = vld [vmem:[%s431_s1 + $0x8] sm:$0xff]  }
   0x2   :  { %268 = vmatpush3.bf16.msra.mxu0 %v300_v0  ;;  %271 = vmatprep.mubr.msk.bf16.mxu0 %vm339_vm0, %v338_v1  ;;  %v22_v3 = vld [vmem:[%s430_s0] sm:$0xff]  ;;  %v23_v4 = vld [vmem:[%s430_s0 + $0x8] sm:$0xff] }
   0x3   :  { %269 = vmatprep.subr.bf16.mxu0 %v338_v1  ;;  %291 = vmatprep.mubr.msk.bf16.mxu1 %vm339_vm0, %v338_v1  ;;  %v24_v5 = vpack.c.bf16 %v23_v4, %v22_v3 }
   0x6   :  { %270 = vmatpush3.bf16.msra.mxu0 %v301_v2 }
   0x7   :  { %10 = vsyncpa [#allocation3], 0  ;;  %v302_v6 = vld [vmem:[%s433_s3] sm:$0xff]   ;;  %v303_v7 = vld [vmem:[%s433_s3 + $0x8] sm:$0xff]   ;;  %s340_s17 = smov [#allocation2]  }
   0x8   :  { %276 = vmatpush3.bf16.msra.mxu1 %v302_v6  ;;  %v304_v8 = vld [vmem:[%s433_s3 + $0x10] sm:$0xff]   ;;  %v305_v9 = vld [vmem:[%s433_s3 + $0x18] sm:$0xff]   ;;  %v306_v10 = vld [vmem:[%s433_s3 + $0x20] sm:$0xff]   ;;  %s231_s18 = sshll.u32 %s340_s17, 4  ;;  %s232_s18 = int_to_ptr.vmem [resolvable:$true] %s231_s18 }
   0x9   :  { %272 = vmatmul.mubr.msk.bf16.vlgmr.msra.gmra.mrb[0].mxu0 %vm48_vm1, %v24_v5  ;;  %277 = vmatprep.subr.bf16.mxu1 %v338_v1  ;;  %v307_v11 = vld [vmem:[%s433_s3 + $0x28] sm:$0xff]   ;;  %v308_v12 = vld [vmem:[%s433_s3 + $0x30] sm:$0xff]   ;;  %v309_v13 = vld [vmem:[%s433_s3 + $0x38] sm:$0xff]   ;;  %s314_s19 = scalar_lea.vmem %s232_s18, 256  ;;  %p319_p1 = scmp.lt.s32.totalorder %s232_s18, %s232_s18 }
   0xa   :  { %v242_v14 = vld [vmem:[%s432_s2] ss:$0 sm:$0xff]  ;;  %p315_p0 = scmp.ne.s32.totalorder %s232_s18, %s314_s19  ;;  %p320_p2 = scmp.lt.s32.totalorder %s314_s19, %s314_s19 }
   0xb   :  { %v246_v40 = vld [vmem:[%s434_s4] ss:$0 sm:$0xff] }
   0xc   :  { %278 = vmatpush3.bf16.msra.mxu1 %v303_v7  ;;  %p321_p3 = por %p320_p2, %p319_p1 }
   0xd   :  { %279 = vmatprep.subr.bf16.mxu1 %v338_v1 }
   0xe   :  { %p322_p4 = pnand %p321_p3, %p315_p0 }
  0x10   :  { %280 = vmatpush3.bf16.msra.mxu1 %v304_v8 }
  0x11   :  { %281 = vmatprep.subr.bf16.mxu1 %v338_v1 }
  0x14   :  { %282 = vmatpush3.bf16.msra.mxu1 %v305_v9 }
  0x15   :  { %283 = vmatprep.subr.bf16.mxu1 %v338_v1 }
  0x18   :  { %284 = vmatpush3.bf16.msra.mxu1 %v306_v10 }
  0x19   :  { %285 = vmatprep.subr.bf16.mxu1 %v338_v1 }
  0x1c   :  { %286 = vmatpush3.bf16.msra.mxu1 %v307_v11 }
  0x1d   :  { %287 = vmatprep.subr.bf16.mxu1 %v338_v1 }
  0x20   :  { %288 = vmatpush3.bf16.msra.mxu1 %v308_v12 }
  0x21   :  { %289 = vmatprep.subr.bf16.mxu1 %v338_v1 }
  0x24   :  { %290 = vmatpush3.bf16.msra.mxu1 %v309_v13 }
  0xdc   :  { %v86_v15 = vpop.f32.mrb[0].mxu0 }
  0xdd   :  { %v87_v16 = vadd.f32 %v242_v14, %v86_v15  ;;  %v273_v17 = vpop.f32.mrb[1].mxu0 }
  0xde   :  { %v89_v18 = vpop.f32.mrb[2].mxu0 }
  0xdf   :  { %v95_v19 = vmul.f32 %v87_v16, %v87_v16  ;;  %v90_v20 = vadd.f32 %v242_v14, %v89_v18  ;;  %v274_v21 = vpop.f32.mrb[3].mxu0  ;;  %v93_v34 = vmul.f32 0.5, %v87_v16 }
  0xe1   :  { %v97_v22 = vmul.f32 %v95_v19, %v87_v16  ;;  %v96_v23 = vmul.f32 %v90_v20, %v90_v20  ;;  %v94_v35 = vmul.f32 0.5, %v90_v20 }
  0xe3   :  { %v99_v24 = vmul.f32 0.044715, %v97_v22  ;;  %v98_v25 = vmul.f32 %v96_v23, %v90_v20 }
  0xe5   :  { %v101_v26 = vadd.f32 %v99_v24, %v87_v16  ;;  %v100_v27 = vmul.f32 0.044715, %v98_v25 }
  0xe7   :  { %v103_v28 = vmul.f32 0.7978845, %v101_v26  ;;  %v102_v29 = vadd.f32 %v100_v27, %v90_v20 }
  0xe9   :  { %310 = vtanh.f32 %v103_v28  ;;  %v104_v30 = vmul.f32 0.7978845, %v102_v29 }
  0xeb   :  { %312 = vtanh.f32 %v104_v30 }
  0xf3   :  { %v311_v31 = vpop.eup %310 }
  0xf4   :  { %v107_v32 = vadd.f32 1.0, %v311_v31 }
  0xf5   :  { %v313_v33 = vpop.eup %312 }
  0xf6   :  { %v108_v36 = vadd.f32 1.0, %v313_v33  ;;  %v109_v37 = vmul.f32 %v107_v32, %v93_v34 }
  0xf8   :  { %v110_v38 = vmul.f32 %v108_v36, %v94_v35 }
  0xfa   :  { %v111_v39 = vpack.c.bf16 %v110_v38, %v109_v37 }
  0xfc   :  { %292 = vmatmul.mubr.bf16.vlgmr.msra.gmra.mrb[0].mxu1 %v111_v39 }
 0x1cf   :  { %v217_v41 = vpop.f32.mrb[0].mxu1 }
 0x1d0   :  { %v218_v42 = vadd.f32 %v246_v40, %v217_v41  ;;  %v293_v43 = vpop.f32.mrb[1].mxu1 }
 0x1d1   :  { %v220_v44 = vpop.f32.mrb[2].mxu1 }
 0x1d2   :  { %224 = vst.msk [vmem:[#allocation2] sm:$0xff] %vm48_vm1, %v218_v42  ;;  %v221_v45 = vadd.f32 %v246_v40, %v220_v44  ;;  %v294_v46 = vpop.f32.mrb[3].mxu1 }
 0x1d4   :  { %225 = vst.msk [vmem:[#allocation2 + $0x8] sm:$0xff] %vm48_vm1, %v221_v45 }
 0x1d5   :  { %325 = shalt.err (!%p322_p4)
}
 0x1d6   :  { %s326_s21 = scalar_lea.hbm %s435_s5, 256 }
 0x1d7   :  { %p327_p5 = scmp.ne.s32.totalorder %s435_s5, %s326_s21  ;;  %p330_p6 = scmp.lt.u32.totalorder %s326_s21, %s435_s5 }
 0x1d9   :  { %p332_p7 = pnand %p330_p6, %p327_p5 }
 0x1db   :  { %335 = shalt.err (!%p332_p7)
}
 0x1dc   :  { %s341_s26 = smov 128   ;;  %s342_s1 = smov 8  }
 0x1dd   :  { %237 = dma.vmem_to_hbm [thread:$0]  %s232_s18, 256, %s435_s5, [#allocation3], %s341_s26, %s341_s26, %s342_s1  }
 0x1de   :  { %336 = dma.done.wait [#allocation3], 256  }
 0x1df   :  { %337 = vsyncadd [#allocation3], 4294967040 }
 0x1e0   :  { %241 = vsyncpa [#allocation3], 1 }

</bundles_post_ra>
